<compile_context>
chip_gen: v6e
topology: v6e:2x2x1
jax: 0.10.0
libtpu: 0.0.40
codegen_flags: <defaults>
</compile_context>

<pallas_src>
import functools

import jax
import jax.numpy as jnp
from jax import lax
from jax.experimental import pallas as pl
from jax.experimental.pallas import tpu as pltpu

_LANE = 128


def _round_up(n, m):
    return ((n + m - 1) // m) * m


def _round_down(n, m):
    return (n // m) * m


def _categorical_kernel(x_ref, w_ref, b_ref, logits_ref):
    """One batch tile.

    x_ref      : (TB, num_inputs)            f32  -- batch tile, module-native layout
    w_ref      : (num_outputs, num_inputs)   bf16 -- torch-native layout, grid-resident
    b_ref      : (num_outputs, 1)            f32  -- grid-resident
    logits_ref : (num_outputs, TB)           f32  -- classes on sublanes, batch on lanes
    """
    # bf16 cast happens in VMEM (VPU has slack); HBM only ever sees f32 x once.
    xb = x_ref[...].astype(jnp.bfloat16)

    # raw[c, b] = sum_k w[c, k] * x[b, k]  ->  (num_outputs, TB), batch on lanes.
    raw = lax.dot_general(
        w_ref[...], xb,
        dimension_numbers=(((1,), (1,)), ((), ())),
        preferred_element_type=jnp.float32,
    ) + b_ref[...]

    # torch.distributions.Categorical(logits=raw) normalization, max-stabilized,
    # reduced over the class axis (8 sublanes) -> every elementwise op is lane-dense.
    m = jnp.max(raw, axis=0, keepdims=True)
    e = jnp.exp(raw - m)
    lse = m + jnp.log(jnp.sum(e, axis=0, keepdims=True))
    logits_ref[...] = raw - lse


def _choose_batch_tile(B, tb):
    """Lane-dense batch tile: multiple of 128 (or the full batch when tiny),
    capped so the parallel grid keeps >= 2 blocks for v7x's 2 TensorCores."""
    if B <= _LANE:
        return B  # single block; full-extent dims satisfy the (8,128) rule
    tb = max(_LANE, _round_down(tb, _LANE))
    half = _round_up(pl.cdiv(B, 2), _LANE)
    return min(tb, half)


@functools.partial(jax.jit, static_argnames=("tb",))
def categorical_forward(x, w, b, *, tb=8192):
    """Normalized logits of FixedCategorical(logits = x @ w.T + b).

    x : (B, num_inputs) f32, w : (num_outputs, num_inputs) torch-native, b : (num_outputs,).
    Returns logits in lane-dense (num_outputs, B) layout; probs = jnp.exp(logits);
    use logits.T for the torch (B, num_outputs) layout.
    """
    B, num_inputs = x.shape
    num_outputs = w.shape[0]

    wb = w.astype(jnp.bfloat16)                        # (8, 32): tiny one-time cast
    b2 = b.reshape(num_outputs, 1).astype(jnp.float32)

    TB = _choose_batch_tile(B, tb)
    grid = (pl.cdiv(B, TB),)                           # ragged last block allowed

    logits = pl.pallas_call(
        _categorical_kernel,
        out_shape=jax.ShapeDtypeStruct((num_outputs, B), jnp.float32),
        grid=grid,
        in_specs=[
            pl.BlockSpec((TB, num_inputs), lambda i: (i, 0)),            # x tile
            pl.BlockSpec((num_outputs, num_inputs), lambda i: (0, 0)),   # W resident
            pl.BlockSpec((num_outputs, 1), lambda i: (0, 0)),            # b resident
        ],
        out_specs=pl.BlockSpec((num_outputs, TB), lambda i: (0, i)),
        compiler_params=pltpu.CompilerParams(
            dimension_semantics=("parallel",),
            # ~200 B/row of VMEM with double buffering; 48 MiB stays under
            # v7x's 64 MiB physical VMEM and is ample on v5e/v6e (128 MiB).
            vmem_limit_bytes=48 * 1024 * 1024,
        ),
    )(x, wb, b2)
    return logits


def orthogonal_init(key, rows, cols, gain):
    """Deterministic equivalent of torch.nn.init.orthogonal_ for a (rows, cols) matrix."""
    n_big, n_small = max(rows, cols), min(rows, cols)
    a = jax.random.normal(key, (n_big, n_small), dtype=jnp.float32)
    q, r = jnp.linalg.qr(a)
    d = jnp.sign(jnp.diagonal(r))      # sign convention, like PyTorch
    q = q * d[None, :]
    if rows < cols:
        q = q.T
    return gain * q[:rows, :cols]


if __name__ == "__main__":
    key = jax.random.PRNGKey(0)
    k_x, k_w, k_x2, k_x3 = jax.random.split(key, 4)

    num_inputs = 32    # hidden size feeding the Categorical head
    num_outputs = 8    # number of discrete actions

    # Parameters matching nn.Linear(num_inputs, num_outputs), orthogonal_(gain=0.01), zero bias.
    w = orthogonal_init(k_w, num_outputs, num_inputs, gain=0.01)   # torch-native (out, in)
    b = jnp.zeros((num_outputs,), dtype=jnp.float32)

    def reference_logits_cb(x):
        # Same bf16 cast of x / W that the kernel's MXU path uses; softmax in f32.
        xf = x.astype(jnp.bfloat16).astype(jnp.float32)
        wf = w.astype(jnp.bfloat16).astype(jnp.float32)
        raw = xf @ wf.T + b[None, :]
        logits = raw - jax.scipy.special.logsumexp(raw, axis=-1, keepdims=True)
        return logits.T                                           # (num_outputs, B)

    # Module-native small shape: batch=2 hidden vectors -> 8 discrete actions.
    x = jax.random.normal(k_x, (2, num_inputs), dtype=jnp.float32)
    logits = categorical_forward(x, w, b)
    jax.block_until_ready(logits)
    assert logits.shape == (num_outputs, 2)
    probs = jnp.exp(logits)   # FixedCategorical probs, derived outside the kernel
    assert jnp.allclose(logits, reference_logits_cb(x), atol=1e-5, rtol=1e-5), "logits mismatch"
    assert jnp.allclose(jnp.sum(probs, axis=0), 1.0, atol=1e-5), "probs not normalized"

    # Multi-block grid with a ragged last tile (B not a multiple of the 128-lane tile).
    x2 = jax.random.normal(k_x2, (200, num_inputs), dtype=jnp.float32)
    logits2 = categorical_forward(x2, w, b)
    jax.block_until_ready(logits2)
    assert jnp.allclose(logits2, reference_logits_cb(x2), atol=1e-5, rtol=1e-5), "tiled logits mismatch"

    # Explicitly small tile -> several pipelined grid steps, still ragged at the tail.
    x3 = jax.random.normal(k_x3, (520, num_inputs), dtype=jnp.float32)
    logits3 = categorical_forward(x3, w, b, tb=128)
    jax.block_until_ready(logits3)
    assert jnp.allclose(logits3, reference_logits_cb(x3), atol=1e-5, rtol=1e-5), "multi-step logits mismatch"

    print("KERNEL_OK")
</pallas_src>

<mosaic_0001>
module attributes {stable_mosaic.version = 11 : i64} {
  func.func @_categorical_kernel(%arg0: i32, %arg1: memref<2x32xf32, #tpu.memory_space<vmem>>, %arg2: memref<8x32xbf16, #tpu.memory_space<vmem>>, %arg3: memref<8x1xf32, #tpu.memory_space<vmem>>, %arg4: memref<8x2xf32, #tpu.memory_space<vmem>>) attributes {dimension_semantics = [#tpu.dimension_semantics<parallel>], iteration_bounds = array<i64: 1>, scalar_prefetch = 0 : i64, scratch_operands = 0 : i64, tpu.core_type = #tpu.core_type<tc>, window_params = [{transform_indices = @transform_0, window_bounds = array<i64: 2, 32>}, {pipeline_mode = #tpu.pipeline_mode<synchronous>, transform_indices = @transform_1, window_bounds = array<i64: 8, 32>}, {pipeline_mode = #tpu.pipeline_mode<synchronous>, transform_indices = @transform_2, window_bounds = array<i64: 8, 1>}, {transform_indices = @transform_3, window_bounds = array<i64: 8, 2>}]} {
    %c0 = arith.constant 0 : index
    %c0_0 = arith.constant 0 : index
    %0 = vector.load %arg1[%c0, %c0_0] : memref<2x32xf32, #tpu.memory_space<vmem>>, vector<2x32xf32>
    %1 = arith.truncf %0 : vector<2x32xf32> to vector<2x32xbf16>
    %c0_1 = arith.constant 0 : index
    %c0_2 = arith.constant 0 : index
    %2 = vector.load %arg2[%c0_1, %c0_2] : memref<8x32xbf16, #tpu.memory_space<vmem>>, vector<8x32xbf16>
    %cst = arith.constant dense<0.000000e+00> : vector<8x2xf32>
    %3 = tpu.matmul %2, %1, %cst {dimension_numbers = #tpu.dot_dimension_numbers<[1], [1], [0], [0], [0, 0, 1, 0], [], []>} : vector<8x32xbf16>, vector<2x32xbf16>, vector<8x2xf32> -> vector<8x2xf32>
    %c0_3 = arith.constant 0 : index
    %c0_4 = arith.constant 0 : index
    %4 = vector.load %arg3[%c0_3, %c0_4] : memref<8x1xf32, #tpu.memory_space<vmem>>, vector<8x1xf32>
    %5 = vector.broadcast %4 : vector<8x1xf32> to vector<8x2xf32>
    %6 = arith.addf %3, %5 : vector<8x2xf32>
    %cst_5 = arith.constant dense<0xFF800000> : vector<2xf32>
    %7 = vector.multi_reduction <maximumf>, %6, %cst_5 [0] : vector<8x2xf32> to vector<2xf32>
    %8 = vector.shape_cast %7 : vector<2xf32> to vector<1x2xf32>
    %9 = vector.broadcast %8 : vector<1x2xf32> to vector<8x2xf32>
    %10 = arith.subf %6, %9 : vector<8x2xf32>
    %11 = math.exp %10 : vector<8x2xf32>
    %cst_6 = arith.constant dense<0.000000e+00> : vector<2xf32>
    %12 = vector.multi_reduction <add>, %11, %cst_6 [0] : vector<8x2xf32> to vector<2xf32>
    %13 = vector.shape_cast %12 : vector<2xf32> to vector<1x2xf32>
    %14 = math.log %13 : vector<1x2xf32>
    %15 = arith.addf %8, %14 : vector<1x2xf32>
    %16 = vector.broadcast %15 : vector<1x2xf32> to vector<8x2xf32>
    %17 = arith.subf %6, %16 : vector<8x2xf32>
    %c0_7 = arith.constant 0 : index
    %c0_8 = arith.constant 0 : index
    %18 = vector.load %arg4[%c0_7, %c0_8] : memref<8x2xf32, #tpu.memory_space<vmem>>, vector<8x2xf32>
    tpu.vector_store %arg4[%c0_7, %c0_8], %17 {strides = array<i32>} : memref<8x2xf32, #tpu.memory_space<vmem>>, vector<8x2xf32>,
    return
  }
  func.func @transform_0(%arg0: i32) -> (i32, i32) {
    %c0_i32 = arith.constant 0 : i32
    %c0_i32_0 = arith.constant 0 : i32
    return %arg0, %c0_i32 : i32, i32
  }
  func.func @transform_1(%arg0: i32) -> (i32, i32) {
    %c0_i32 = arith.constant 0 : i32
    %c0_i32_0 = arith.constant 0 : i32
    %c0_i32_1 = arith.constant 0 : i32
    return %c0_i32, %c0_i32_0 : i32, i32
  }
  func.func @transform_2(%arg0: i32) -> (i32, i32) {
    %c0_i32 = arith.constant 0 : i32
    %c0_i32_0 = arith.constant 0 : i32
    %c0_i32_1 = arith.constant 0 : i32
    return %c0_i32, %c0_i32_0 : i32, i32
  }
  func.func @transform_3(%arg0: i32) -> (i32, i32) {
    %c0_i32 = arith.constant 0 : i32
    %c0_i32_0 = arith.constant 0 : i32
    return %c0_i32, %arg0 : i32, i32
  }
}

</mosaic_0001>

<bundles_post_ra>
// kernel: categorical_forward.1
= control target key start
LH: loop header
LB: loop body
LE: loop exit
PB: predicated region body
PF: predicated region fallthrough
CT: control target
= control target key end

     0   :  { %v115_v0 = vmov 0.0   ;;  %vm24_vm0 = vcmask 261120   ;;  %vm116_vm1 = vmmov 0   ;;  %v117_v4 = vmov 0   ;;  %s153_s0 = inlined_call_operand.vmem [shape: f32[2,32], index: 0, kind: input, shape index: {}]   ;;  %s154_s2 = inlined_call_operand.vmem [shape: f32[8,1], index: 2, kind: input, shape index: {}]   ;;  %s155_s1 = inlined_call_operand.vmem [shape: bf16[8,32], index: 1, kind: input, shape index: {}]   ;;  %s156_s3 = inlined_call_operand.vmem [shape: f32[8,2], index: 3, kind: output, shape index: {}]  }
   0x1   :  { %101 = vmatprep.subr.bf16.mxu0 %v115_v0  ;;  %v15_v1 = vld [vmem:[%s153_s0] sm:$0x3]  ;;  %103 = vmatprep.mubr.msk.bf16.mxu0 %vm116_vm1, %v115_v0  ;;  %vm71_vm2 = vcmask 15360  }
   0x2   :  { %v18_v2 = vld [vmem:[%s154_s2] sm:$0xff]  ;;  %v16_v3 = vpack.c.bf16 %v15_v1, %v15_v1  ;;  %110 = vset.pattern.permute.xlu0 %v117_v4 }
   0x3   :  { %21 = vperm.xlu0 %110, %v18_v2   ;;  %v17_v6 = vld [vmem:[%s155_s1] sm:$0xf] }
   0x4   :  { %v29_v5 = vsel %vm24_vm0, %v16_v3, 0 }
   0x5   :  { %102 = vmatpush3.bf16.xpose.msra.mxu0 %v29_v5 }
   0xc   :  { %104 = vmatmul.mubr.msk.bf16.vlgmr.msra.gmra.mxu0 %vm24_vm0, %v17_v6 }
  0x7e   :  { %v22_v7 = vpop.permute.xlu0 %21 }
  0xcc   :  { %v65_v8 = vpop.f32.mrf.mxu0 }
  0xcd   :  { %v66_v9 = vadd.f32 %v65_v8, %v22_v7 }
  0xce   :  { %v105_v10 = vpop.f32.mrf.mxu0 }
  0xcf   :  { %v72_v11 = vsel %vm71_vm2, %v66_v9, -inf }
  0xd0   :  { %v73_v12 = vrot.slane %v72_v11, 4  ;;  %v68_v13 = vpop.f32.mrf.mxu0 }
  0xd2   :  { %v74_v14 = vmax.f32 %v72_v11, %v73_v12  ;;  %v106_v15 = vpop.f32.mrf.mxu0 }
  0xd4   :  { %v75_v16 = vrot.slane %v74_v14, 2 }
  0xd6   :  { %v76_v17 = vmax.f32 %v74_v14, %v75_v16 }
  0xd8   :  { %v77_v18 = vrot.slane %v76_v17, 1 }
  0xda   :  { %v78_v19 = vmax.f32 %v76_v17, %v77_v18 }
  0xdc   :  { %v79_v20 = vsub.f32 %v66_v9, %v78_v19 }
  0xde   :  { %v80_v21 = vmul.f32 1.442695, %v79_v20 }
  0xe0   :  { %111 = vpow2.f32 %v80_v21 }
  0xed   :  { %v112_v22 = vpop.eup %111 }
  0xee   :  { %v82_v23 = vsel %vm71_vm2, %v112_v22, 0.0 }
  0xef   :  { %v83_v24 = vrot.slane %v82_v23, 4 }
  0xf1   :  { %v84_v25 = vadd.f32 %v83_v24, %v82_v23 }
  0xf3   :  { %v85_v26 = vrot.slane %v84_v25, 2 }
  0xf5   :  { %v86_v27 = vadd.f32 %v85_v26, %v84_v25 }
  0xf7   :  { %v87_v28 = vrot.slane %v86_v27, 1 }
  0xf9   :  { %v88_v29 = vadd.f32 %v87_v28, %v86_v27 }
  0xfb   :  { %113 = vlog2.f32 %v88_v29 }
 0x108   :  { %v114_v30 = vpop.eup %113 }
 0x109   :  { %v90_v31 = vmul.f32 0.6931472, %v114_v30 }
 0x10b   :  { %v91_v32 = vadd.f32 %v90_v31, %v78_v19 }
 0x10d   :  { %v92_v33 = vsub.f32 %v66_v9, %v91_v32 }
 0x10f   :  { %93 = vst.msk [vmem:[%s156_s3] sm:$0xff] %vm71_vm2, %v92_v33 }

</bundles_post_ra>
